<compile_context>
chip_gen: v7x
topology: tpu7x:2x2x1
jax: 0.10.0
libtpu: 0.0.40
codegen_flags: <defaults>
</compile_context>

<pallas_src>
import jax
import jax.numpy as jnp
from jax.experimental import pallas as pl
from jax.experimental.pallas import tpu as pltpu

_HI = jax.lax.Precision.HIGHEST


def _stats_kernel(x_ref, s_ref, a_ref):
    """Per-group streaming reduction over M tiles: S += sum(x), A += x @ x.T."""
    @pl.when(pl.program_id(1) == 0)
    def _():
        s_ref[...] = jnp.zeros_like(s_ref)
        a_ref[...] = jnp.zeros_like(a_ref)

    x = x_ref[0]                                        # (L, TM) f32
    s_ref[0] += jnp.sum(x, axis=1, keepdims=True)       # (L, 1)
    # A += x @ x.T  (contract over the M tile; no explicit transpose needed)
    a_ref[0] += jax.lax.dot_general(
        x, x, (((1,), (1,)), ((), ())),
        precision=_HI, preferred_element_type=jnp.float32)


def _whiten_kernel(sub_ref, b_ref, x_ref, o_ref):
    """y = sub_eff @ x + b_eff  (affine + centering correction pre-folded)."""
    y = jnp.dot(sub_ref[0], x_ref[0],
                precision=_HI, preferred_element_type=jnp.float32)
    o_ref[0] = y + b_ref[0]


def _pick_m_tile(m, l, target_bytes=4 * 1024 * 1024):
    """Lane-dense M tile: multiple of 128, divides M, (L,TM) f32 ~<= 4 MiB.

    Keeps (double-buffered inputs + outputs) well inside the 32 MiB scoped
    VMEM default on v5e/v6e and the 64 MiB physical VMEM on v7x.
    """
    if m % 128 != 0:
        return m  # single full block along M (allowed when block == full dim)
    tm = max(128, min(m, (target_bytes // (l * 4)) // 128 * 128))
    while m % tm != 0:
        tm -= 128
    return tm


def zca_norm_svd_unstable_forward(x, weight, bias, groups=4, eps=1e-4):
    N, C, H, W = x.shape
    G = groups
    assert C % G == 0
    L = C // G
    M = N * H * W

    xf = jnp.transpose(x, (1, 0, 2, 3)).reshape(C, M).astype(jnp.float32)
    xg = xf.reshape(G, L, M)

    TM = _pick_m_tile(M, L)
    n_m = M // TM

    # --- Pallas kernel 1: per-group sums + uncentered Gram (M-tiled) --------
    s, a = pl.pallas_call(
        _stats_kernel,
        out_shape=(jax.ShapeDtypeStruct((G, L, 1), jnp.float32),
                   jax.ShapeDtypeStruct((G, L, L), jnp.float32)),
        grid_spec=pltpu.PrefetchScalarGridSpec(
            num_scalar_prefetch=0,
            grid=(G, n_m),
            in_specs=[pl.BlockSpec((1, L, TM), lambda g, m: (g, 0, m))],
            out_specs=(pl.BlockSpec((1, L, 1), lambda g, m: (g, 0, 0)),
                       pl.BlockSpec((1, L, L), lambda g, m: (g, 0, 0)))),
        compiler_params=pltpu.CompilerParams(
            dimension_semantics=("parallel", "arbitrary")),
    )(xg)

    # --- JAX glue: finalize gram, SVD + "unstable" rule, fold affine --------
    mu = s / M                                                    # (G, L, 1)
    gram = a / M - mu * jnp.swapaxes(mu, -1, -2)                  # (G, L, L)
    gram = gram + eps * jnp.eye(L, dtype=jnp.float32)

    # TODO(synk): torch.svd has no Pallas equivalent; done with jnp.linalg.svd.
    _, e, vh = jnp.linalg.svd(gram)               # e: (G, L) descending
    v = jnp.swapaxes(vh, -1, -2)                  # columns = singular vectors
    le = e <= eps
    # PyTorch loop: counter = first j with e[j] <= eps, plus 1; else stays 1.
    counter = jnp.where(jnp.any(le, axis=-1), jnp.argmax(le, axis=-1) + 1, 1)
    mask = jnp.arange(L)[None, :] < counter[:, None]              # (G, L)
    scale = jnp.where(mask, jax.lax.rsqrt(e), 0.0)                # (G, L)
    subspace = jnp.einsum('gij,gj,gkj->gik', v, scale, v, precision=_HI)

    wg = weight.astype(jnp.float32).reshape(G, L, 1)
    bg = bias.astype(jnp.float32).reshape(G, L, 1)
    # y = w*(sub@(x-mu)) + b  ==  (w*sub)@x + (b - (w*sub)@mu)
    sub_eff = wg * subspace                                       # (G, L, L)
    b_eff = bg - jnp.einsum('gij,gjk->gik', sub_eff, mu, precision=_HI)

    # --- Pallas kernel 2: whitening matmul + folded affine (M-tiled) --------
    xr = pl.pallas_call(
        _whiten_kernel,
        out_shape=jax.ShapeDtypeStruct((G, L, M), jnp.float32),
        grid_spec=pltpu.PrefetchScalarGridSpec(
            num_scalar_prefetch=0,
            grid=(G, n_m),
            in_specs=[pl.BlockSpec((1, L, L), lambda g, m: (g, 0, 0)),
                      pl.BlockSpec((1, L, 1), lambda g, m: (g, 0, 0)),
                      pl.BlockSpec((1, L, TM), lambda g, m: (g, 0, m))],
            out_specs=pl.BlockSpec((1, L, TM), lambda g, m: (g, 0, m))),
        compiler_params=pltpu.CompilerParams(
            dimension_semantics=("parallel", "parallel")),
    )(sub_eff, b_eff, xg)

    out = xr.reshape(C, N, H, W).transpose(1, 0, 2, 3)
    # TODO(synk): running_mean / running_subspace EMA buffer updates are module
    # state side-effects (no_grad) and are not produced by this forward.
    return out.astype(x.dtype)


def reference_forward(x, weight, bias, groups=4, eps=1e-4):
    """Pure-JAX line-by-line port of the PyTorch training-mode forward."""
    N, C, H, W = x.shape
    G = groups
    L = C // G
    xf = jnp.transpose(x, (1, 0, 2, 3)).reshape(C, -1).astype(jnp.float32)
    mu = xf.mean(1, keepdims=True)
    xf = xf - mu
    xxt = (jnp.matmul(xf, xf.T, precision=_HI) / (N * H * W)
           + jnp.eye(C, dtype=jnp.float32) * eps)
    outs = []
    for i in range(G):
        blk = xxt[i * L:(i + 1) * L, i * L:(i + 1) * L]
        _, e, vh = jnp.linalg.svd(blk)
        v = vh.T
        e_host = jax.device_get(e)
        counter = 1
        for j in range(L):
            if e_host[j] <= eps:
                counter = j + 1
                break
        sub = jnp.zeros((L, L), jnp.float32)
        for j in range(counter):
            vec = v[:, j][:, None]
            sub = sub + jnp.matmul(vec, jax.lax.rsqrt(e[j]) * vec.T,
                                   precision=_HI)
        outs.append(jnp.matmul(sub, xf[i * L:(i + 1) * L], precision=_HI))
    xr = jnp.concatenate(outs, axis=0)
    xr = xr * weight + bias
    return xr.reshape(C, N, H, W).transpose(1, 0, 2, 3)


if __name__ == "__main__":
    key = jax.random.PRNGKey(0)
    k_x, k_w = jax.random.split(key)

    N, C, H, W = 2, 16, 8, 8
    G = 4
    eps = 1e-4

    x = jax.random.normal(k_x, (N, C, H, W), jnp.float32)
    # module __init__: weight (C,1) ~ uniform_(), bias (C,1) zeros
    weight = jax.random.uniform(k_w, (C, 1), jnp.float32)
    bias = jnp.zeros((C, 1), jnp.float32)

    out = zca_norm_svd_unstable_forward(x, weight, bias, groups=G, eps=eps)
    out = jax.block_until_ready(out)

    ref = reference_forward(x, weight, bias, groups=G, eps=eps)
    assert out.shape == (N, C, H, W)
    err = float(jnp.max(jnp.abs(out - ref)))
    assert jnp.allclose(out, ref, rtol=2e-3, atol=2e-3), f"max abs err {err}"

    print("KERNEL_OK")
</pallas_src>

<mosaic_0001>
module attributes {stable_mosaic.version = 11 : i64} {
  func.func @_stats_kernel(%arg0: i32, %arg1: i32, %arg2: memref<1x4x128xf32, #tpu.memory_space<vmem>>, %arg3: memref<1x4x1xf32, #tpu.memory_space<vmem>>, %arg4: memref<1x4x4xf32, #tpu.memory_space<vmem>>) attributes {dimension_semantics = [#tpu.dimension_semantics<parallel>, #tpu.dimension_semantics<arbitrary>], iteration_bounds = array<i64: 4, 1>, scalar_prefetch = 0 : i64, scratch_operands = 0 : i64, tpu.core_type = #tpu.core_type<tc>, window_params = [{transform_indices = @transform_0, window_bounds = array<i64: 1, 4, 128>}, {transform_indices = @transform_1, window_bounds = array<i64: 1, 4, 1>}, {transform_indices = @transform_2, window_bounds = array<i64: 1, 4, 4>}]} {
    %c0_i32 = arith.constant 0 : i32
    %0 = arith.cmpi eq, %arg1, %c0_i32 : i32
    %1 = arith.extui %0 : i1 to i32
    %c0_i32_0 = arith.constant 0 : i32
    %2 = arith.cmpi ne, %1, %c0_i32_0 : i32
    scf.if %2 {
      %cst_16 = arith.constant 0.000000e+00 : f32
      %20 = vector.broadcast %cst_16 : f32 to vector<1x4x1xf32>
      %c0_17 = arith.constant 0 : index
      %c0_18 = arith.constant 0 : index
      %c0_19 = arith.constant 0 : index
      %21 = vector.load %arg3[%c0_17, %c0_18, %c0_19] : memref<1x4x1xf32, #tpu.memory_space<vmem>>, vector<1x4x1xf32>
      tpu.vector_store %arg3[%c0_17, %c0_18, %c0_19], %20 {strides = array<i32>} : memref<1x4x1xf32, #tpu.memory_space<vmem>>, vector<1x4x1xf32>,
      %cst_20 = arith.constant 0.000000e+00 : f32
      %22 = vector.broadcast %cst_20 : f32 to vector<1x4x4xf32>
      %c0_21 = arith.constant 0 : index
      %c0_22 = arith.constant 0 : index
      %c0_23 = arith.constant 0 : index
      %23 = vector.load %arg4[%c0_21, %c0_22, %c0_23] : memref<1x4x4xf32, #tpu.memory_space<vmem>>, vector<1x4x4xf32>
      tpu.vector_store %arg4[%c0_21, %c0_22, %c0_23], %22 {strides = array<i32>} : memref<1x4x4xf32, #tpu.memory_space<vmem>>, vector<1x4x4xf32>,
    } else {
    }
    %c0 = arith.constant 0 : index
    %c0_1 = arith.constant 0 : index
    %c0_2 = arith.constant 0 : index
    %3 = vector.load %arg2[%c0, %c0_1, %c0_2] : memref<1x4x128xf32, #tpu.memory_space<vmem>>, vector<1x4x128xf32>
    %4 = vector.shape_cast %3 : vector<1x4x128xf32> to vector<4x128xf32>
    %c0_3 = arith.constant 0 : index
    %c0_4 = arith.constant 0 : index
    %c0_5 = arith.constant 0 : index
    %5 = vector.load %arg3[%c0_3, %c0_4, %c0_5] : memref<1x4x1xf32, #tpu.memory_space<vmem>>, vector<1x4x1xf32>
    %6 = vector.shape_cast %5 : vector<1x4x1xf32> to vector<4x1xf32>
    %cst = arith.constant dense<0.000000e+00> : vector<4xf32>
    %7 = vector.multi_reduction <add>, %4, %cst [1] : vector<4x128xf32> to vector<4xf32>
    %8 = vector.shape_cast %7 : vector<4xf32> to vector<4x1xf32>
    %9 = arith.addf %6, %8 : vector<4x1xf32>
    %c0_6 = arith.constant 0 : index
    %c0_7 = arith.constant 0 : index
    %c0_8 = arith.constant 0 : index
    %10 = vector.load %arg3[%c0_6, %c0_7, %c0_8] : memref<1x4x1xf32, #tpu.memory_space<vmem>>, vector<1x4x1xf32>
    %11 = vector.shape_cast %10 : vector<1x4x1xf32> to vector<4x1xf32>
    %12 = vector.shape_cast %9 : vector<4x1xf32> to vector<1x4x1xf32>
    tpu.vector_store %arg3[%c0_6, %c0_7, %c0_8], %12 {strides = array<i32>} : memref<1x4x1xf32, #tpu.memory_space<vmem>>, vector<1x4x1xf32>,
    %c0_9 = arith.constant 0 : index
    %c0_10 = arith.constant 0 : index
    %c0_11 = arith.constant 0 : index
    %13 = vector.load %arg4[%c0_9, %c0_10, %c0_11] : memref<1x4x4xf32, #tpu.memory_space<vmem>>, vector<1x4x4xf32>
    %14 = vector.shape_cast %13 : vector<1x4x4xf32> to vector<4x4xf32>
    %cst_12 = arith.constant dense<0.000000e+00> : vector<4x4xf32>
    %15 = tpu.matmul %4, %4, %cst_12 {dimension_numbers = #tpu.dot_dimension_numbers<[1], [1], [0], [0], [0, 0, 1, 0], [], []>, precision = #tpu.contract_precision<fp32>} : vector<4x128xf32>, vector<4x128xf32>, vector<4x4xf32> -> vector<4x4xf32>
    %16 = arith.addf %14, %15 : vector<4x4xf32>
    %c0_13 = arith.constant 0 : index
    %c0_14 = arith.constant 0 : index
    %c0_15 = arith.constant 0 : index
    %17 = vector.load %arg4[%c0_13, %c0_14, %c0_15] : memref<1x4x4xf32, #tpu.memory_space<vmem>>, vector<1x4x4xf32>
    %18 = vector.shape_cast %17 : vector<1x4x4xf32> to vector<4x4xf32>
    %19 = vector.shape_cast %16 : vector<4x4xf32> to vector<1x4x4xf32>
    tpu.vector_store %arg4[%c0_13, %c0_14, %c0_15], %19 {strides = array<i32>} : memref<1x4x4xf32, #tpu.memory_space<vmem>>, vector<1x4x4xf32>,
    return
  }
  func.func @transform_0(%arg0: i32, %arg1: i32) -> (i32, i32, i32) {
    %c0_i32 = arith.constant 0 : i32
    %c0_i32_0 = arith.constant 0 : i32
    return %arg0, %c0_i32, %arg1 : i32, i32, i32
  }
  func.func @transform_1(%arg0: i32, %arg1: i32) -> (i32, i32, i32) {
    %c0_i32 = arith.constant 0 : i32
    %c0_i32_0 = arith.constant 0 : i32
    %c0_i32_1 = arith.constant 0 : i32
    return %arg0, %c0_i32, %c0_i32_0 : i32, i32, i32
  }
  func.func @transform_2(%arg0: i32, %arg1: i32) -> (i32, i32, i32) {
    %c0_i32 = arith.constant 0 : i32
    %c0_i32_0 = arith.constant 0 : i32
    %c0_i32_1 = arith.constant 0 : i32
    return %arg0, %c0_i32, %c0_i32_0 : i32, i32, i32
  }
}

</mosaic_0001>

<bundles_post_ra>
// kernel: tpu_custom_call.1
= control target key start
LH: loop header
LB: loop body
LE: loop exit
PB: predicated region body
PF: predicated region fallthrough
CT: control target
= control target key end

     0   :  { %8 = vsyncpa [#allocation3], 0  ;;  %s1222_s0 = inlined_call_operand.hbm [shape: f32[4,4,128], index: 0, kind: input, shape index: {}]   ;;  %s1223_s1 = inlined_call_operand.vmem [shape: f32[4,4,1], index: 1, kind: output, shape index: {0}]   ;;  %s1224_s2 = inlined_call_operand.hbm [shape: f32[4,4,4], index: 2, kind: output, shape index: {1}]  }
   0x1   :  { %10 = vsyncpa [#allocation3 + $0x1], 0 }
   0x2   :  { %11 = vsyncpa [#allocation4], 0 }
   0x3   :  { %13 = vsyncpa [#allocation4 + $0x1], 0  ;;  %s1029_s9 = smov 0   ;;  %s1031_s10 = smov 0  }
   0x4   :  { %s1033_s11 = smov 0   ;;  %s1035_s12 = smov 0  }
   0x5   :  { %s1037_s13 = smov 0   ;;  %s1039_s14 = smov 0  }
   0x6 LB: > { %s776_s15 = sadd.s32 4294967295, %s1008_s14   ;;  %s777_s16 = sadd.s32 4294967294, %s1008_s14   ;;  %s1008_s14 = sphi %s1039_s14, %s19_s14   ;;  %s1004_s13 = sphi %s1037_s13, %s1239_s13   ;;  %s1000_s12 = sphi %s1035_s12, %s1238_s12   ;;  %s996_s11 = sphi %s1033_s11, %s1237_s11   ;;  %s992_s10 = sphi %s1031_s10, %s1236_s10   ;;  %s988_s9 = sphi %s1029_s9, %s1235_s9  }
   0x7   : > { %s31_s17 = sadd.s32 1, %s1004_s13  ;;  %s40_s18 = sadd.s32 1, %s996_s11 }
   0x8   : > { %p33_p0 = scmp.ge.s32.totalorder %s31_s17, 4  ;;  %p47_p1 = scmp.ne.s32.totalorder %s996_s11, %s992_s10 }
   0x9   : > { %p48_p2 = scmp.eq.s32.totalorder %s1008_s14, 0  ;;  %p53_p3 = scmp.ne.s32.totalorder %s992_s10, %s988_s9 }
   0xa   : > { %s1241_s17 = smov (%p33_p0, %s31_s17), 0  ;;  %p54_p5 = scmp.eq.s32.totalorder %s776_s15, 0 }
   0xb   : > { %p1070_p4 = por %p48_p2, %p47_p1  ;;  %s35_s20 = ssub.s32 %s1004_s13, %s1241_s17 }
   0xc   : > { %p103_p6 = scmp.eq.s32.totalorder %s776_s15, 3  ;;  %p38_p7 = scmp.eq.s32.totalorder %s35_s20, 0 }
   0xd   : > { %p1076_p8 = por %p54_p5, %p53_p3  ;;  %p109_p10 = scmp.eq.s32.totalorder %s777_s16, 3 }
   0xe   : > { %p1080_p9 = por %p103_p6, %p47_p1  ;;  %p844_p12 = scmp.lt.s32.totalorder %s1008_s14, 4 }
   0xf   : > { %s1085_s23 = scalar_select %p38_p7, %s996_s11, %s40_s18  }
  0x10   : > { %s1228_s22 = scalar_select %p1080_p9, 1, 0 }
  0x11   : > { %p1087_p11 = por %p109_p10, %p53_p3  ;;  %s129_s25 = sand.u32 1, %s996_s11  }
  0x12   : > { %s780_s26 = sshll.u32 %s129_s25, 2  ;;  %s781_s27 = sshll.u32 %s1004_s13, 6 }
  0x13   : > { %s1229_s24 = scalar_select %p1087_p11, 1, 0 }
  0x14   : > { %s1097_s30 = scalar_lea.hbm %s1222_s0, %s781_s27  ;;  %s133_s3 = scalar_lea.vmem [#allocation2], %s780_s26 }
  0x15   : > { %s141_s4 = sshll.u32 %s133_s3, 4  ;;  %p1103_p13 = pnand %p844_p12, %p1070_p4  ;;  %s1099_s4 = int_to_ptr.vmem [resolvable:$true] %s141_s4 }
  0x16   : > { %s130_s6 = scalar_lea.sflag [#allocation3], %s129_s25  ;;  %s896_s7 = scalar_lea.hbm %s1097_s30, 64 }
  0x17   : > { %p897_p2 = scmp.ne.s32.totalorder %s1097_s30, %s896_s7  ;;  %p898_p3 = pneg %p1103_p13 }
  0x18   : > { %s901_s16 = scalar_lea.hbm %s1222_s0, 256  ;;  %p902_p4 = scmp.lt.u32.totalorder %s1097_s30, %s1222_s0 }
  0x19   : > { %p899_p5 = pnand %p898_p3, %p897_p2  ;;  %p903_p7 = scmp.lt.u32.totalorder %s901_s16, %s896_s7 }
  0x1a   : > { %p905_p12 = scmp.lt.u32.totalorder %s896_s7, %s1097_s30 }
  0x1b   : > { %p900_p6 = pneg %p899_p5  ;;  %p904_p10 = por %p903_p7, %p902_p4 }
  0x1d   : > { %p906_p0 = por %p905_p12, %p904_p10 }
  0x1f   : > { %p907_p1 = pnand %p906_p0, %p900_p6 }
  0x21   : > { %910 = shalt.err (!%p907_p1)
}
  0x22   : > { %s911_s20 = scalar_lea.vmem %s1099_s4, 64  ;;  %s1010_s25 = smov [#allocation2]  }
  0x23   : > { %p912_p2 = scmp.ne.s32.totalorder %s1099_s4, %s911_s20  ;;  %s916_s26 = sshll.u32 %s1010_s25, 4  ;;  %s917_s26 = int_to_ptr.vmem [resolvable:$false] %s916_s26 }
  0x24   : > { %s918_s27 = scalar_lea.vmem %s917_s26, 128  ;;  %p919_p9 = scmp.lt.s32.totalorder %s1099_s4, %s917_s26 }
  0x25   : > { %p914_p5 = pnand %p912_p2, %p898_p3  ;;  %p920_p4 = scmp.lt.s32.totalorder %s918_s27, %s911_s20 }
  0x27   : > { %p915_p11 = pneg %p914_p5  ;;  %p921_p7 = por %p920_p4, %p919_p9 }
  0x29   : > { %p922_p10 = pnand %p921_p7, %p915_p11 }
  0x2b   : > { %925 = shalt.err (!%p922_p10)
}
  0x2c   : > { %839 = dma.hbm_to_vmem [thread:$0]  (!%p1103_p13), %s1097_s30, 64, %s1099_s4, %s130_s6  }
  0x2d   : > { %p1231_p0 = scmp.lt.s32.totalorder %s1008_s14, 5  ;;  %p1232_p1 = scmp.ge.s32.totalorder %s1008_s14, 1 }
  0x2f   : > { %p147_p3 = pnand %p1232_p1, %p1231_p0 }
  0x30   : > { %s1139_s28 = sand.u32 (!%p147_p3), 1, %s992_s10  }
  0x31   : > { %150 = sbr.rel (%p147_p3) target bundleno = 309 (0x135), region = 24  ;;  %s783_s29 = sshll.u32 (!%p147_p3), %s1139_s28, 2 }
  0x32   : > { %s153_s3 = scalar_lea.sflag (!%p147_p3), [#allocation3], %s1139_s28  ;;  %s156_s5 = scalar_lea.vmem (!%p147_p3), [#allocation2], %s783_s29 }
  0x38   : > { %979 = dma.done.wait (%p1076_p8), %s153_s3, 64  }
  0x39   : > { %981 = vsyncadd (%p1076_p8), %s153_s3, 4294967232  ;;  %v1011_v0 = vmov 0.0   ;;  %vm1012_vm0 = vmmov 0   ;;  %vm195_vm1 = vcmask 1043456   ;;  %v193_v1 = vld [vmem:[%s156_s5] sm:$0xf] }
  0x3a   : > { %802 = vmatprep.subr.mxu0 %v1011_v0  ;;  %807 = vmatprep.subr.mxu1 %v1011_v0  ;;  %v204_v2 = vand.u32 4294901760, %v193_v1  ;;  %v196_v3 = vsel %vm195_vm1, %v193_v1, 0.0  ;;  %p181_p8 = scmp.lt.s32.totalorder %s1000_s12, 3  ;;  %vm191_vm2 = vcmask 27648   ;;  %s1159_s4 = scalar_lea.vmem [#allocation5], %s783_s29  ;;  %vm189_vm3 = vcmask 3072  }
  0x3b   : > { %804 = vmatprep.mubr.msk.f32.mxu0 %vm1012_vm0, %v1011_v0  ;;  %809 = vmatprep.mubr.msk.f32.mxu1 %vm1012_vm0, %v1011_v0  ;;  %192 = vst.msk [vmem:[%s1159_s4] sm:$0xf] %vm191_vm2, %v1011_v0  ;;  %s787_s15 = sshll.u32 %s1000_s12, 6  ;;  %s673_s16 = sshll.u32 %s1159_s4, 4  ;;  %s1174_s16 = int_to_ptr.vmem [resolvable:$true] %s673_s16 }
  0x3c   : > { %197 = vadd.xlane.f32.xlu0 %v196_v3  ;;  %803 = vmatpush3.xpose.msra.mxu0 %v204_v2  ;;  %v270_v4 = vsub.f32 %v193_v1, %v204_v2  ;;  %s182_s21 = scalar_select %p181_p8, %s1000_s12, 3 }
  0x3d   : > { %812 = vmatprep.subr.mxu0 %v1011_v0  ;;  %s1172_s20 = scalar_lea.hbm %s1224_s2, %s787_s15  ;;  %s657_s25 = scalar_lea.sflag [#allocation4], %s1139_s28 }
  0x3e   : > { %v271_v5 = vand.u32 4294901760, %v270_v4  ;;  %s785_s30 = sshll.u32 %s182_s21, 2  ;;  %s926_s26 = scalar_lea.vmem %s1174_s16, 64 }
  0x3f   : > { %s184_s8 = scalar_lea.vmem %s1223_s1, %s785_s30  ;;  %p927_p9 = scmp.ne.s32.totalorder %s1174_s16, %s926_s26 }
  0x40   : > { %v272_v6 = vsub.f32 %v270_v4, %v271_v5  ;;  %190 = vst.msk [vmem:[%s184_s8] sm:$0xf] %vm189_vm3, %v1011_v0  ;;  %p1233_p11 = scmp.ne.s32.totalorder %s1228_s22, 0  ;;  %s1013_s12 = smov [#allocation5]  }
  0x41   : > { %s930_s27 = sshll.u32 %s1013_s12, 4  ;;  %s931_s27 = int_to_ptr.vmem [resolvable:$false] %s930_s27 }
  0x42   : > { %v273_v7 = vand.u32 4294901760, %v272_v6  ;;  %v202_v25 = vld [vmem:[%s1159_s4] sm:$0xf]  ;;  %p928_p13 = pnand %p927_p9, %p1233_p11  ;;  %s932_s29 = scalar_lea.vmem %s931_s27, 128 }
  0x43   : > { %p933_p12 = scmp.lt.s32.totalorder %s1174_s16, %s931_s27  ;;  %p934_p2 = scmp.lt.s32.totalorder %s932_s29, %s926_s26 }
  0x44   : > { %808 = vmatpush3.xpose.msra.mxu1 %v273_v7  ;;  %805 = vmatmul.mubr.f32.vlgmr.msra.gmra.mrb[0].mxu0 %v273_v7  ;;  %p929_p6 = pneg %p928_p13 }
  0x45   : > { %813 = vmatpush3.xpose.msra.mxu0 %v270_v4  ;;  %817 = vmatprep.subr.mxu1 %v1011_v0  ;;  %p935_p5 = por %p934_p2, %p933_p12 }
  0x46   : > { %814 = vmatprep.mubr.msk.f32.mxu0 %vm1012_vm0, %v1011_v0  ;;  %822 = vmatprep.subr.mxu0 %v1011_v0 }
  0x47   : > { %810 = vmatmul.mubr.f32.vlgmr.msra.gmra.mrb[0].mxu1 %v204_v2  ;;  %v194_v8 = vld [vmem:[%s184_s8] sm:$0xf]  ;;  %p936_p4 = pnand %p935_p5, %p929_p6 }
  0x48   : > { %818 = vmatpush3.xpose.msra.mxu1 %v204_v2  ;;  %815 = vmatmul.mubr.f32.vlgmr.msra.gmra.mrb[2].mxu0 %v270_v4 }
  0x49   : > { %819 = vmatprep.mubr.msk.f32.mxu1 %vm1012_vm0, %v1011_v0  ;;  %823 = vmatpush3.xpose.msra.mxu0 %v271_v5 }
  0x4a   : > { %827 = vmatprep.subr.mxu1 %v1011_v0  ;;  %824 = vmatprep.mubr.msk.f32.mxu0 %vm1012_vm0, %v1011_v0 }
  0x4b   : > { %820 = vmatmul.mubr.f32.vlgmr.msra.gmra.mrb[2].mxu1 %v271_v5 }
  0x4c   : > { %828 = vmatpush3.xpose.msra.mxu1 %v204_v2  ;;  %825 = vmatmul.mubr.f32.vlgmr.msra.gmra.mrb[4].mxu0 %v204_v2 }
  0x4d   : > { %829 = vmatprep.mubr.msk.f32.mxu1 %vm1012_vm0, %v1011_v0 }
  0x4f   : > { %830 = vmatmul.mubr.f32.vlgmr.msra.gmra.mrb[4].mxu1 %v204_v2 }
  0xc9   : > { %v198_v9 = vpop.xlane.xlu0 %197 }
  0xca   : > { %v199_v10 = vadd.f32 %v198_v9, %v194_v8 }
  0xcc   : > { %201 = vst.msk [vmem:[%s184_s8] sm:$0xf] %vm189_vm3, %v199_v10 }
 0x117   : > { %v275_v11 = vpop.f32.mrb[0].mxu0 }
 0x118   : > { %v806_v12 = vpop.f32.mrb[1].mxu0 }
 0x11a   : > { %v351_v13 = vpop.f32.mrb[0].mxu1 }
 0x11b   : > { %v352_v14 = vadd.f32 %v351_v13, %v275_v11  ;;  %v811_v15 = vpop.f32.mrb[1].mxu1  ;;  %v425_v16 = vpop.f32.mrb[2].mxu0 }
 0x11c   : > { %v816_v17 = vpop.f32.mrb[3].mxu0 }
 0x11d   : > { %v426_v18 = vadd.f32 %v425_v16, %v352_v14 }
 0x11e   : > { %v499_v19 = vpop.f32.mrb[2].mxu1 }
 0x11f   : > { %v500_v20 = vadd.f32 %v499_v19, %v426_v18  ;;  %v821_v21 = vpop.f32.mrb[3].mxu1  ;;  %v573_v22 = vpop.f32.mrb[4].mxu0 }
 0x120   : > { %v826_v23 = vpop.f32.mrb[5].mxu0 }
 0x121   : > { %v574_v24 = vadd.f32 %v573_v22, %v500_v20 }
 0x122   : > { %v645_v26 = vpop.f32.mrb[4].mxu1 }
 0x123   : > { %v646_v27 = vadd.f32 %v645_v26, %v574_v24  ;;  %v831_v28 = vpop.f32.mrb[5].mxu1 }
 0x125   : > { %v649_v29 = vadd.f32 %v646_v27, %v202_v25 }
 0x127   : > { %651 = vst.msk [vmem:[%s1159_s4] sm:$0xf] %vm191_vm2, %v649_v29 }
 0x128   : > { %939 = shalt.err (!%p936_p4)
}
 0x129   : > { %s940_s28 = scalar_lea.hbm %s1172_s20, 64  ;;  %s944_s21 = scalar_lea.hbm %s1224_s2, 256 }
 0x12a   : > { %p941_p7 = scmp.ne.s32.totalorder %s1172_s20, %s940_s28  ;;  %p945_p1 = scmp.lt.u32.totalorder %s1172_s20, %s1224_s2 }
 0x12b   : > { %p946_p3 = scmp.lt.u32.totalorder %s944_s21, %s940_s28  ;;  %p948_p9 = scmp.lt.u32.totalorder %s940_s28, %s1172_s20 }
 0x12c   : > { %p942_p10 = pnand %p941_p7, %p1233_p11 }
 0x12d   : > { %p947_p8 = por %p946_p3, %p945_p1 }
 0x12e   : > { %p943_p0 = pneg %p942_p10 }
 0x12f   : > { %p949_p13 = por %p948_p9, %p947_p8 }
 0x131   : > { %p950_p6 = pnand %p949_p13, %p943_p0 }
 0x133   : > { %953 = shalt.err (!%p950_p6)
}
 0x134   : > { %834 = dma.vmem_to_hbm [thread:$0]  (%p1233_p11), %s1174_s16, 64, %s1172_s20, %s657_s25  }
 0x135 PF: > { %p845_p12 = scmp.ge.s32.totalorder %s1008_s14, 2  ;;  %s692_s6 = sand.u32 1, %s988_s9  }
 0x136   : > { %p1234_p2 = scmp.ne.s32.totalorder %s1229_s24, 0  ;;  %s693_s7 = scalar_lea.sflag [#allocation4], %s692_s6 }
 0x138   : > { %p841_p5 = pnand %p845_p12, %p1234_p2 }
 0x13a   : > { %983 = dma.done.wait (!%p841_p5), %s693_s7, 64  }
 0x13b   : > { %985 = vsyncadd (!%p841_p5), %s693_s7, 4294967232  ;;  %s19_s14 = sadd.s32 1, %s1008_s14   ;;  %s1235_s9 = smov %s992_s10 }
 0x13c   : > { %p16_p4 = scmp.ge.s32.totalorder %s19_s14, 6   ;;  %s1236_s10 = smov %s996_s11 }
 0x13d   : > { %s1237_s11 = smov %s1085_s23  ;;  %s1238_s12 = smov %s1004_s13 }
 0x13e   : > { %s1239_s13 = smov %s1241_s17  ;;  %18 = sbr.rel (!%p16_p4) target bundleno = 6 (0x6), region = 85 }
 0x145   :  { %698 = vsyncpa [#allocation3], 1 }
 0x146   :  { %700 = vsyncpa [#allocation3 + $0x1], 1 }
 0x147   :  { %701 = vsyncpa [#allocation4], 1 }
 0x148   :  { %703 = vsyncpa [#allocation4 + $0x1], 1 }

</bundles_post_ra>
